<compile_context>
chip_gen: v5e
topology: v5e:2x2
jax: 0.10.0
libtpu: 0.0.40
codegen_flags: <defaults>
</compile_context>

<pallas_src>
import functools
import math

import jax
import jax.numpy as jnp
from jax.experimental import pallas as pl
from jax.experimental.pallas import tpu as pltpu

_LANE = 128      # TPU lane width (last dim)
_SUBLANE = 8     # TPU sublane width (second-to-last dim, f32)
_MARGIN = 2 * 1024 * 1024   # compiler-internal scratch margin


def _round_up(x, m):
    return ((x + m - 1) // m) * m


def _cdiv(a, b):
    return -(-a // b)


@functools.lru_cache(maxsize=None)
def _vmem_caps():
    """Returns (physical_vmem_bytes, usable_budget_bytes)."""
    try:
        cap = int(pltpu.get_tpu_info().vmem_capacity_bytes)
    except Exception:
        cap = 64 * 1024 * 1024   # v7x per-TensorCore size: safe everywhere
    return cap, cap - 8 * 1024 * 1024   # headroom for Mosaic internal scratch


# --------------------------------------------------------------------------
# Kernels
# --------------------------------------------------------------------------
def _mlp_kernel_resident(x_ref, w1_ref, b1_ref, w2_ref, b2_ref, o_ref):
    # fc1 on the MXU: bf16 inputs, f32 accumulation.
    h = jnp.dot(x_ref[...], w1_ref[...], preferred_element_type=jnp.float32)
    h = h + b1_ref[...]                              # f32 bias (VPU, free)
    # tanh-approx GELU: goes to the EUP slot, hidden under the MXU.
    h = jax.nn.gelu(h, approximate=True)
    # dropout(p=0.0) is identity — skipped.
    o = jnp.dot(h.astype(w2_ref.dtype), w2_ref[...],
                preferred_element_type=jnp.float32)
    o_ref[...] = (o + b2_ref[...]).astype(o_ref.dtype)


def _mlp_kernel_tiled(x_ref, w1_ref, b1_ref, w2_ref, b2_ref, o_ref, acc_ref):
    # Hidden-dim streaming: per step process one (in_p, th)/(th, out_p) panel
    # pair, accumulate fc2 partial products into an f32 scratch accumulator.
    k = pl.program_id(1)

    @pl.when(k == 0)
    def _():
        acc_ref[...] = jnp.zeros_like(acc_ref)

    h = jnp.dot(x_ref[...], w1_ref[...], preferred_element_type=jnp.float32)
    h = h + b1_ref[...]
    h = jax.nn.gelu(h, approximate=True)
    acc_ref[...] += jnp.dot(h.astype(w2_ref.dtype), w2_ref[...],
                            preferred_element_type=jnp.float32)

    @pl.when(k == pl.num_programs(1) - 1)
    def _():
        o_ref[...] = (acc_ref[...] + b2_ref[...]).astype(o_ref.dtype)


# --------------------------------------------------------------------------
# Tiling / VMEM plan (all static-shape Python)
# --------------------------------------------------------------------------
def _plan(n, in_f, hid, out_f, force_hidden_tiling):
    in_p = _round_up(in_f, _LANE)
    hid_p = _round_up(hid, _LANE)
    out_p = _round_up(out_f, _LANE)
    n8 = _round_up(max(n, 1), _SUBLANE)
    cap, budget = _vmem_caps()

    def resident_bytes(tm):
        weights = (in_p * hid_p + hid_p * out_p) * 2 + (hid_p + out_p) * 4
        acts = 2 * tm * in_p * 2 + 2 * tm * out_p * 4   # double-buffered tiles
        inter = 6 * tm * hid_p                          # f32 + bf16 hidden tile
        return weights + acts + inter + _MARGIN

    def tiled_bytes(tm, th):
        weights = 2 * (in_p * th + th * out_p) * 2 + 2 * th * 4 + out_p * 4
        acts = 2 * tm * in_p * 2 + 2 * tm * out_p * 4 + tm * out_p * 4  # +acc
        inter = 6 * tm * th
        return weights + acts + inter + _MARGIN

    def token_steps(tm_cap):
        # Pick step count first, then split rows evenly on the 8-row sublane:
        # minimizes zero-row padding and guarantees >=2 steps (both v7x TCs).
        steps = _cdiv(n8, tm_cap)
        if n8 >= 2 * _SUBLANE:
            steps = max(steps, 2)
        tm = _round_up(_cdiv(n8, steps), _SUBLANE)
        while tm > tm_cap:
            steps += 1
            tm = _round_up(_cdiv(n8, steps), _SUBLANE)
        return steps, tm

    if not force_hidden_tiling:
        for tm_cap in (1024, 512, 256, 128, 64, 32, 16, 8):
            if resident_bytes(tm_cap) <= budget:
                steps, tm = token_steps(tm_cap)
                limit = min(max(resident_bytes(tm), 16 * 1024 * 1024),
                            cap - 4 * 1024 * 1024)
                return dict(mode="resident", tm=tm, th=hid_p, n_p=steps * tm,
                            in_p=in_p, hid_p=hid_p, out_p=out_p,
                            vmem_limit=int(limit))

    # Hidden-dim streaming path (weights too big to be VMEM-resident).
    th_cands = sorted({t for t in (128, 256, 512, 1024, 2048, 4096, hid_p)
                       if t <= hid_p and hid_p % t == 0}, reverse=True)
    if force_hidden_tiling and hid_p > _LANE:
        th_cands = [t for t in th_cands if t < hid_p]
    chosen = None
    for tm_cap in (512, 256, 128, 64, 32, 16, 8):
        for th in th_cands:
            if tiled_bytes(tm_cap, th) <= budget:
                chosen = (tm_cap, th)
                break
        if chosen is not None:
            break
    if chosen is None:
        chosen = (8, 128)   # last resort; let the compiler try
    tm_cap, th = chosen
    steps, tm = token_steps(tm_cap)
    limit = min(max(tiled_bytes(tm, th), 16 * 1024 * 1024),
                cap - 4 * 1024 * 1024)
    return dict(mode="tiled", tm=tm, th=th, n_p=steps * tm,
                in_p=in_p, hid_p=hid_p, out_p=out_p, vmem_limit=int(limit))


# --------------------------------------------------------------------------
# pallas_call builder + public wrappers
# --------------------------------------------------------------------------
def _run_pallas(xp, w1p, b1p, w2p, b2p, plan, single_buffer):
    tm, th = plan["tm"], plan["th"]
    in_p, hid_p, out_p, n_p = (plan["in_p"], plan["hid_p"], plan["out_p"],
                               plan["n_p"])
    n_steps = n_p // tm

    cost = pl.CostEstimate(
        flops=2 * n_p * (in_p * hid_p + hid_p * out_p),
        transcendentals=n_p * hid_p,
        bytes_accessed=(n_p * in_p * 2 + in_p * hid_p * 2 + hid_p * out_p * 2
                        + hid_p * 4 + out_p * 4 + n_p * out_p * 4),
    )

    if plan["mode"] == "resident":
        # Constant index_map => weights stay VMEM-resident; single-buffer them
        # (Buffered(1)) so they aren't pointlessly double-buffered.
        wmode = dict(pipeline_mode=pl.Buffered(1)) if single_buffer else {}
        grid_spec = pltpu.PrefetchScalarGridSpec(
            num_scalar_prefetch=0,
            grid=(n_steps,),
            in_specs=[
                pl.BlockSpec((tm, in_p), lambda i: (i, 0)),
                pl.BlockSpec((in_p, hid_p), lambda i: (0, 0), **wmode),
                pl.BlockSpec((1, hid_p), lambda i: (0, 0), **wmode),
                pl.BlockSpec((hid_p, out_p), lambda i: (0, 0), **wmode),
                pl.BlockSpec((1, out_p), lambda i: (0, 0), **wmode),
            ],
            out_specs=pl.BlockSpec((tm, out_p), lambda i: (i, 0)),
        )
        kernel = _mlp_kernel_resident
        dims = ("parallel",)
    else:
        k_steps = hid_p // th
        grid_spec = pltpu.PrefetchScalarGridSpec(
            num_scalar_prefetch=0,
            grid=(n_steps, k_steps),
            in_specs=[
                pl.BlockSpec((tm, in_p), lambda i, k: (i, 0)),
                pl.BlockSpec((in_p, th), lambda i, k: (0, k)),
                pl.BlockSpec((1, th), lambda i, k: (0, k)),
                pl.BlockSpec((th, out_p), lambda i, k: (k, 0)),
                pl.BlockSpec((1, out_p), lambda i, k: (0, 0)),
            ],
            out_specs=pl.BlockSpec((tm, out_p), lambda i, k: (i, 0)),
            scratch_shapes=[pltpu.VMEM((tm, out_p), jnp.float32)],
        )
        kernel = _mlp_kernel_tiled
        dims = ("parallel", "arbitrary")

    return pl.pallas_call(
        kernel,
        out_shape=jax.ShapeDtypeStruct((n_p, out_p), jnp.float32),
        grid_spec=grid_spec,
        compiler_params=pltpu.CompilerParams(
            dimension_semantics=dims,
            vmem_limit_bytes=plan["vmem_limit"],
        ),
        cost_estimate=cost,
    )(xp, w1p, b1p, w2p, b2p)


@functools.partial(jax.jit, static_argnames=("in_f", "hid", "out_f",
                                             "force_hidden_tiling",
                                             "single_buffer"))
def _mlp_forward_impl(x2d, w1p, b1p, w2p, b2p, *, in_f, hid, out_f,
                      force_hidden_tiling, single_buffer):
    n = x2d.shape[0]
    plan = _plan(n, in_f, hid, out_f, force_hidden_tiling)
    in_p, n_p = plan["in_p"], plan["n_p"]

    xp = x2d.astype(jnp.bfloat16)
    if n_p != n or in_p != in_f:     # only pad when actually needed
        xp = jnp.pad(xp, ((0, n_p - n), (0, in_p - in_f)))

    out_padded = _run_pallas(xp, w1p, b1p, w2p, b2p, plan, single_buffer)
    # Slice lane/token padding off; output stays f32 (caller-facing dtype).
    return out_padded[:n, :out_f]


_SINGLE_BUFFER_WEIGHTS = None   # probed lazily: does this JAX accept Buffered(1)?


def mlp_forward(x2d, params, force_hidden_tiling=False):
    """x2d: [N, in_f] f32; params: output of prepare_mlp_params."""
    global _SINGLE_BUFFER_WEIGHTS
    args = (x2d, params["w1p"], params["b1p"], params["w2p"], params["b2p"])
    kw = dict(in_f=params["in_f"], hid=params["hid"], out_f=params["out_f"],
              force_hidden_tiling=force_hidden_tiling)
    if _SINGLE_BUFFER_WEIGHTS is None:
        try:
            out = _mlp_forward_impl(*args, **kw, single_buffer=True)
            jax.block_until_ready(out)
            _SINGLE_BUFFER_WEIGHTS = True
            return out
        except Exception:
            _SINGLE_BUFFER_WEIGHTS = False   # fall back to default buffering
    return _mlp_forward_impl(*args, **kw,
                             single_buffer=_SINGLE_BUFFER_WEIGHTS)


def prepare_mlp_params(w1, b1, w2, b2):
    """One-time pad (+128-lane) and bf16 cast of the weights; biases stay f32.

    Weights are stored [in, out] (transposed vs PyTorch's nn.Linear [out, in]).
    Doing this once removes a full HBM pass over both weight matrices from
    every forward call.
    """
    # TODO(synk): optional v7x fp8 weight path (with f32-epilogue scales) would
    # halve weight residency again; not enabled here pending accuracy checks.
    in_f, hid = w1.shape
    out_f = w2.shape[1]
    in_p = _round_up(in_f, _LANE)
    hid_p = _round_up(hid, _LANE)
    out_p = _round_up(out_f, _LANE)
    w1p = jnp.pad(w1.astype(jnp.bfloat16), ((0, in_p - in_f), (0, hid_p - hid)))
    w2p = jnp.pad(w2.astype(jnp.bfloat16), ((0, hid_p - hid), (0, out_p - out_f)))
    b1p = jnp.pad(b1.astype(jnp.float32), (0, hid_p - hid)).reshape(1, hid_p)
    b2p = jnp.pad(b2.astype(jnp.float32), (0, out_p - out_f)).reshape(1, out_p)
    return dict(w1p=w1p, b1p=b1p, w2p=w2p, b2p=b2p,
                in_f=in_f, hid=hid, out_f=out_f)


def init_mlp_params(key, in_features, hidden_features, out_features):
    """Deterministic init mimicking nn.Linear (uniform +-1/sqrt(fan_in))."""
    k1, k2, k3, k4 = jax.random.split(key, 4)
    bound1 = 1.0 / math.sqrt(in_features)
    bound2 = 1.0 / math.sqrt(hidden_features)
    w1 = jax.random.uniform(k1, (in_features, hidden_features),
                            jnp.float32, -bound1, bound1)
    b1 = jax.random.uniform(k2, (hidden_features,), jnp.float32, -bound1, bound1)
    w2 = jax.random.uniform(k3, (hidden_features, out_features),
                            jnp.float32, -bound2, bound2)
    b2 = jax.random.uniform(k4, (out_features,), jnp.float32, -bound2, bound2)
    return w1, b1, w2, b2


def reference_mlp(x, w1, b1, w2, b2):
    h = x @ w1 + b1[None, :]
    h = jax.nn.gelu(h, approximate=False)
    return h @ w2 + b2[None, :]


if __name__ == "__main__":
    key = jax.random.PRNGKey(0)
    kx, kp, kx2, kp2 = jax.random.split(key, 4)

    # --- Test 1: small shapes, resident-weight path -----------------------
    batch, seq = 2, 8
    in_features, hidden_features, out_features = 32, 64, 32
    x = jax.random.normal(kx, (batch, seq, in_features), dtype=jnp.float32)
    w1, b1, w2, b2 = init_mlp_params(kp, in_features, hidden_features,
                                     out_features)
    params = prepare_mlp_params(w1, b1, w2, b2)

    x2d = x.reshape(batch * seq, in_features)          # glue: flatten tokens
    out2d = mlp_forward(x2d, params)
    out = out2d.reshape(batch, seq, out_features)
    jax.block_until_ready(out)

    ref = reference_mlp(x2d, w1, b1, w2, b2).reshape(batch, seq, out_features)
    assert jnp.allclose(out, ref, atol=3e-2, rtol=3e-2), \
        "mismatch vs reference (resident path)"

    # --- Test 2: force the hidden-dim streaming / accumulator path --------
    n2, in2, hid2, out2f = 300, 256, 512, 192
    x2 = jax.random.normal(kx2, (n2, in2), dtype=jnp.float32)
    w1b, b1b, w2b, b2b = init_mlp_params(kp2, in2, hid2, out2f)
    params2 = prepare_mlp_params(w1b, b1b, w2b, b2b)

    out2 = mlp_forward(x2, params2, force_hidden_tiling=True)
    jax.block_until_ready(out2)
    ref2 = reference_mlp(x2, w1b, b1b, w2b, b2b)
    assert jnp.allclose(out2, ref2, atol=5e-2, rtol=5e-2), \
        "mismatch vs reference (hidden-tiled path)"

    # dropout(p=0.0) is an identity op; no kernel work needed.
    print("KERNEL_OK")
</pallas_src>

<mosaic_0001>
module attributes {stable_mosaic.version = 11 : i64} {
  func.func @_mlp_kernel_resident(%arg0: i32, %arg1: memref<8x128xbf16, #tpu.memory_space<vmem>>, %arg2: memref<128x128xbf16, #tpu.memory_space<vmem>>, %arg3: memref<1x128xf32, #tpu.memory_space<vmem>>, %arg4: memref<128x128xbf16, #tpu.memory_space<vmem>>, %arg5: memref<1x128xf32, #tpu.memory_space<vmem>>, %arg6: memref<8x128xf32, #tpu.memory_space<vmem>>) attributes {dimension_semantics = [#tpu.dimension_semantics<parallel>], iteration_bounds = array<i64: 2>, scalar_prefetch = 0 : i64, scratch_operands = 0 : i64, tpu.core_type = #tpu.core_type<tc>, window_params = [{transform_indices = @transform_0, window_bounds = array<i64: 8, 128>}, {pipeline_mode = #tpu.pipeline_mode<synchronous>, transform_indices = @transform_1, window_bounds = array<i64: 128, 128>}, {pipeline_mode = #tpu.pipeline_mode<synchronous>, transform_indices = @transform_2, window_bounds = array<i64: 1, 128>}, {pipeline_mode = #tpu.pipeline_mode<synchronous>, transform_indices = @transform_3, window_bounds = array<i64: 128, 128>}, {pipeline_mode = #tpu.pipeline_mode<synchronous>, transform_indices = @transform_4, window_bounds = array<i64: 1, 128>}, {transform_indices = @transform_5, window_bounds = array<i64: 8, 128>}]} {
    %c0 = arith.constant 0 : index
    %c0_0 = arith.constant 0 : index
    %0 = vector.load %arg1[%c0, %c0_0] : memref<8x128xbf16, #tpu.memory_space<vmem>>, vector<8x128xbf16>
    %c0_1 = arith.constant 0 : index
    %c0_2 = arith.constant 0 : index
    %1 = vector.load %arg2[%c0_1, %c0_2] : memref<128x128xbf16, #tpu.memory_space<vmem>>, vector<128x128xbf16>
    %cst = arith.constant dense<0.000000e+00> : vector<8x128xf32>
    %2 = tpu.matmul %0, %1, %cst {dimension_numbers = #tpu.dot_dimension_numbers<[1], [0], [0], [1], [0, 0, 1, 1], [], []>} : vector<8x128xbf16>, vector<128x128xbf16>, vector<8x128xf32> -> vector<8x128xf32>
    %c0_3 = arith.constant 0 : index
    %c0_4 = arith.constant 0 : index
    %3 = vector.load %arg3[%c0_3, %c0_4] : memref<1x128xf32, #tpu.memory_space<vmem>>, vector<1x128xf32>
    %4 = vector.broadcast %3 : vector<1x128xf32> to vector<8x128xf32>
    %5 = arith.addf %2, %4 : vector<8x128xf32>
    %6 = arith.mulf %5, %5 : vector<8x128xf32>
    %7 = arith.mulf %5, %6 : vector<8x128xf32>
    %cst_5 = arith.constant 4.471500e-02 : f32
    %8 = vector.broadcast %cst_5 : f32 to vector<8x128xf32>
    %9 = arith.mulf %8, %7 : vector<8x128xf32>
    %10 = arith.addf %5, %9 : vector<8x128xf32>
    %cst_6 = arith.constant 0.797884583 : f32
    %11 = vector.broadcast %cst_6 : f32 to vector<8x128xf32>
    %12 = arith.mulf %11, %10 : vector<8x128xf32>
    %13 = math.tanh %12 : vector<8x128xf32>
    %cst_7 = arith.constant 1.000000e+00 : f32
    %14 = vector.broadcast %cst_7 : f32 to vector<8x128xf32>
    %15 = arith.addf %14, %13 : vector<8x128xf32>
    %cst_8 = arith.constant 5.000000e-01 : f32
    %16 = vector.broadcast %cst_8 : f32 to vector<8x128xf32>
    %17 = arith.mulf %16, %15 : vector<8x128xf32>
    %18 = arith.mulf %5, %17 : vector<8x128xf32>
    %19 = arith.truncf %18 : vector<8x128xf32> to vector<8x128xbf16>
    %c0_9 = arith.constant 0 : index
    %c0_10 = arith.constant 0 : index
    %20 = vector.load %arg4[%c0_9, %c0_10] : memref<128x128xbf16, #tpu.memory_space<vmem>>, vector<128x128xbf16>
    %cst_11 = arith.constant dense<0.000000e+00> : vector<8x128xf32>
    %21 = tpu.matmul %19, %20, %cst_11 {dimension_numbers = #tpu.dot_dimension_numbers<[1], [0], [0], [1], [0, 0, 1, 1], [], []>} : vector<8x128xbf16>, vector<128x128xbf16>, vector<8x128xf32> -> vector<8x128xf32>
    %c0_12 = arith.constant 0 : index
    %c0_13 = arith.constant 0 : index
    %22 = vector.load %arg5[%c0_12, %c0_13] : memref<1x128xf32, #tpu.memory_space<vmem>>, vector<1x128xf32>
    %23 = vector.broadcast %22 : vector<1x128xf32> to vector<8x128xf32>
    %24 = arith.addf %21, %23 : vector<8x128xf32>
    %c0_14 = arith.constant 0 : index
    %c0_15 = arith.constant 0 : index
    %25 = vector.load %arg6[%c0_14, %c0_15] : memref<8x128xf32, #tpu.memory_space<vmem>>, vector<8x128xf32>
    tpu.vector_store %arg6[%c0_14, %c0_15], %24 {strides = array<i32>} : memref<8x128xf32, #tpu.memory_space<vmem>>, vector<8x128xf32>,
    return
  }
  func.func @transform_0(%arg0: i32) -> (i32, i32) {
    %c0_i32 = arith.constant 0 : i32
    %c0_i32_0 = arith.constant 0 : i32
    return %arg0, %c0_i32 : i32, i32
  }
  func.func @transform_1(%arg0: i32) -> (i32, i32) {
    %c0_i32 = arith.constant 0 : i32
    %c0_i32_0 = arith.constant 0 : i32
    %c0_i32_1 = arith.constant 0 : i32
    return %c0_i32, %c0_i32_0 : i32, i32
  }
  func.func @transform_2(%arg0: i32) -> (i32, i32) {
    %c0_i32 = arith.constant 0 : i32
    %c0_i32_0 = arith.constant 0 : i32
    %c0_i32_1 = arith.constant 0 : i32
    return %c0_i32, %c0_i32_0 : i32, i32
  }
  func.func @transform_3(%arg0: i32) -> (i32, i32) {
    %c0_i32 = arith.constant 0 : i32
    %c0_i32_0 = arith.constant 0 : i32
    %c0_i32_1 = arith.constant 0 : i32
    return %c0_i32, %c0_i32_0 : i32, i32
  }
  func.func @transform_4(%arg0: i32) -> (i32, i32) {
    %c0_i32 = arith.constant 0 : i32
    %c0_i32_0 = arith.constant 0 : i32
    %c0_i32_1 = arith.constant 0 : i32
    return %c0_i32, %c0_i32_0 : i32, i32
  }
  func.func @transform_5(%arg0: i32) -> (i32, i32) {
    %c0_i32 = arith.constant 0 : i32
    %c0_i32_0 = arith.constant 0 : i32
    return %arg0, %c0_i32 : i32, i32
  }
}

module attributes {stable_mosaic.version = 11 : i64} {
  func.func @_mlp_kernel_resident(%arg0: i32, %arg1: memref<8x128xbf16, #tpu.memory_space<vmem>>, %arg2: memref<128x128xbf16, #tpu.memory_space<vmem>>, %arg3: memref<1x128xf32, #tpu.memory_space<vmem>>, %arg4: memref<128x128xbf16, #tpu.memory_space<vmem>>, %arg5: memref<1x128xf32, #tpu.memory_space<vmem>>, %arg6: memref<8x128xf32, #tpu.memory_space<vmem>>) attributes {dimension_semantics = [#tpu.dimension_semantics<parallel>], iteration_bounds = array<i64: 2>, scalar_prefetch = 0 : i64, scratch_operands = 0 : i64, tpu.core_type = #tpu.core_type<tc>, window_params = [{transform_indices = @transform_0, window_bounds = array<i64: 8, 128>}, {pipeline_mode = #tpu.pipeline_mode<synchronous>, transform_indices = @transform_1, window_bounds = array<i64: 128, 128>}, {pipeline_mode = #tpu.pipeline_mode<synchronous>, transform_indices = @transform_2, window_bounds = array<i64: 1, 128>}, {pipeline_mode = #tpu.pipeline_mode<synchronous>, transform_indices = @transform_3, window_bounds = array<i64: 128, 128>}, {pipeline_mode = #tpu.pipeline_mode<synchronous>, transform_indices = @transform_4, window_bounds = array<i64: 1, 128>}, {transform_indices = @transform_5, window_bounds = array<i64: 8, 128>}]} {
    %c0 = arith.constant 0 : index
    %c0_0 = arith.constant 0 : index
    %0 = vector.load %arg1[%c0, %c0_0] : memref<8x128xbf16, #tpu.memory_space<vmem>>, vector<8x128xbf16>
    %c0_1 = arith.constant 0 : index
    %c0_2 = arith.constant 0 : index
    %1 = vector.load %arg2[%c0_1, %c0_2] : memref<128x128xbf16, #tpu.memory_space<vmem>>, vector<128x128xbf16>
    %cst = arith.constant dense<0.000000e+00> : vector<8x128xf32>
    %2 = tpu.matmul %0, %1, %cst {dimension_numbers = #tpu.dot_dimension_numbers<[1], [0], [0], [1], [0, 0, 1, 1], [], []>} : vector<8x128xbf16>, vector<128x128xbf16>, vector<8x128xf32> -> vector<8x128xf32>
    %c0_3 = arith.constant 0 : index
    %c0_4 = arith.constant 0 : index
    %3 = vector.load %arg3[%c0_3, %c0_4] : memref<1x128xf32, #tpu.memory_space<vmem>>, vector<1x128xf32>
    %4 = vector.broadcast %3 : vector<1x128xf32> to vector<8x128xf32>
    %5 = arith.addf %2, %4 : vector<8x128xf32>
    %6 = arith.mulf %5, %5 : vector<8x128xf32>
    %7 = arith.mulf %5, %6 : vector<8x128xf32>
    %cst_5 = arith.constant 4.471500e-02 : f32
    %8 = vector.broadcast %cst_5 : f32 to vector<8x128xf32>
    %9 = arith.mulf %8, %7 : vector<8x128xf32>
    %10 = arith.addf %5, %9 : vector<8x128xf32>
    %cst_6 = arith.constant 0.797884583 : f32
    %11 = vector.broadcast %cst_6 : f32 to vector<8x128xf32>
    %12 = arith.mulf %11, %10 : vector<8x128xf32>
    %13 = math.tanh %12 : vector<8x128xf32>
    %cst_7 = arith.constant 1.000000e+00 : f32
    %14 = vector.broadcast %cst_7 : f32 to vector<8x128xf32>
    %15 = arith.addf %14, %13 : vector<8x128xf32>
    %cst_8 = arith.constant 5.000000e-01 : f32
    %16 = vector.broadcast %cst_8 : f32 to vector<8x128xf32>
    %17 = arith.mulf %16, %15 : vector<8x128xf32>
    %18 = arith.mulf %5, %17 : vector<8x128xf32>
    %19 = arith.truncf %18 : vector<8x128xf32> to vector<8x128xbf16>
    %c0_9 = arith.constant 0 : index
    %c0_10 = arith.constant 0 : index
    %20 = vector.load %arg4[%c0_9, %c0_10] : memref<128x128xbf16, #tpu.memory_space<vmem>>, vector<128x128xbf16>
    %cst_11 = arith.constant dense<0.000000e+00> : vector<8x128xf32>
    %21 = tpu.matmul %19, %20, %cst_11 {dimension_numbers = #tpu.dot_dimension_numbers<[1], [0], [0], [1], [0, 0, 1, 1], [], []>} : vector<8x128xbf16>, vector<128x128xbf16>, vector<8x128xf32> -> vector<8x128xf32>
    %c0_12 = arith.constant 0 : index
    %c0_13 = arith.constant 0 : index
    %22 = vector.load %arg5[%c0_12, %c0_13] : memref<1x128xf32, #tpu.memory_space<vmem>>, vector<1x128xf32>
    %23 = vector.broadcast %22 : vector<1x128xf32> to vector<8x128xf32>
    %24 = arith.addf %21, %23 : vector<8x128xf32>
    %c0_14 = arith.constant 0 : index
    %c0_15 = arith.constant 0 : index
    %25 = vector.load %arg6[%c0_14, %c0_15] : memref<8x128xf32, #tpu.memory_space<vmem>>, vector<8x128xf32>
    tpu.vector_store %arg6[%c0_14, %c0_15], %24 {strides = array<i32>} : memref<8x128xf32, #tpu.memory_space<vmem>>, vector<8x128xf32>,
    return
  }
  func.func @transform_0(%arg0: i32) -> (i32, i32) {
    %c0_i32 = arith.constant 0 : i32
    %c0_i32_0 = arith.constant 0 : i32
    return %arg0, %c0_i32 : i32, i32
  }
  func.func @transform_1(%arg0: i32) -> (i32, i32) {
    %c0_i32 = arith.constant 0 : i32
    %c0_i32_0 = arith.constant 0 : i32
    %c0_i32_1 = arith.constant 0 : i32
    return %c0_i32, %c0_i32_0 : i32, i32
  }
  func.func @transform_2(%arg0: i32) -> (i32, i32) {
    %c0_i32 = arith.constant 0 : i32
    %c0_i32_0 = arith.constant 0 : i32
    %c0_i32_1 = arith.constant 0 : i32
    return %c0_i32, %c0_i32_0 : i32, i32
  }
  func.func @transform_3(%arg0: i32) -> (i32, i32) {
    %c0_i32 = arith.constant 0 : i32
    %c0_i32_0 = arith.constant 0 : i32
    %c0_i32_1 = arith.constant 0 : i32
    return %c0_i32, %c0_i32_0 : i32, i32
  }
  func.func @transform_4(%arg0: i32) -> (i32, i32) {
    %c0_i32 = arith.constant 0 : i32
    %c0_i32_0 = arith.constant 0 : i32
    %c0_i32_1 = arith.constant 0 : i32
    return %c0_i32, %c0_i32_0 : i32, i32
  }
  func.func @transform_5(%arg0: i32) -> (i32, i32) {
    %c0_i32 = arith.constant 0 : i32
    %c0_i32_0 = arith.constant 0 : i32
    return %arg0, %c0_i32 : i32, i32
  }
}

</mosaic_0001>

<bundles_post_ra>
// kernel: _mlp_forward_impl.1
= control target key start
LH: loop header
LB: loop body
LE: loop exit
PB: predicated region body
PF: predicated region fallthrough
CT: control target
= control target key end

     0   :  { %10 = vsyncpa [#allocation3], 0  ;;  %s967_s0 = inlined_call_operand.vmem [shape: bf16[16,128], index: 0, kind: input, shape index: {}]   ;;  %s968_s1 = inlined_call_operand.hbm [shape: bf16[128,128], index: 1, kind: input, shape index: {}]   ;;  %s969_s2 = inlined_call_operand.vmem [shape: f32[1,128], index: 2, kind: input, shape index: {}]   ;;  %s970_s3 = inlined_call_operand.hbm [shape: bf16[128,128], index: 3, kind: input, shape index: {}]   ;;  %s971_s4 = inlined_call_operand.vmem [shape: f32[1,128], index: 4, kind: input, shape index: {}]   ;;  %s972_s5 = inlined_call_operand.hbm [shape: f32[16,128], index: 5, kind: output, shape index: {}]  }
   0x1   :  { %11 = vsyncpa [#allocation6], 0 }
   0x2   :  { %12 = vsyncpa [#allocation4], 0 }
   0x3   :  { %14 = vsyncpa [#allocation4 + $0x1], 0  ;;  %s851_s18 = smov 0   ;;  %s853_s19 = smov 0  }
   0x4   :  { %s855_s20 = smov 0   ;;  %s857_s21 = smov 0  }
   0x5 LB: > { %s872_s22 = sadd.s32 4294967295, %s815_s21   ;;  %s525_s23 = sadd.s32 4294967294, %s815_s21   ;;  %s815_s21 = sphi %s857_s21, %s979_s21   ;;  %s811_s20 = sphi %s855_s20, %s978_s20   ;;  %s807_s19 = sphi %s853_s19, %s977_s19   ;;  %s803_s18 = sphi %s851_s18, %s976_s18  }
   0x6   : > { %s876_s24 = sadd.s32 1, %s815_s21   ;;  %s137_s25 = sadd.s32 1, %s811_s20 }
   0x7   : > { %s134_s26 = ssub.s32 %s815_s21, %s876_s24  ;;  %p147_p0 = scmp.ne.s32.totalorder %s811_s20, %s807_s19 }
   0x8   : > { %p135_p1 = scmp.eq.s32.totalorder %s134_s26, 0  ;;  %p148_p2 = scmp.eq.s32.totalorder %s872_s22, 1 }
   0x9   : > { %p153_p3 = scmp.ne.s32.totalorder %s807_s19, %s803_s18  ;;  %p154_p4 = scmp.eq.s32.totalorder %s525_s23, 1 }
   0xa   : > { %s887_s27 = scalar_select %p135_p1, %s811_s20, %s137_s25  }
   0xb   : > { %p889_p5 = por %p148_p2, %p147_p0  ;;  %p893_p6 = por %p154_p4, %p153_p3 }
   0xc   : > { %p526_p7 = scmp.ge.s32.totalorder %s815_s21, 1  ;;  %p161_p8 = scmp.lt.s32.totalorder %s815_s21, 3 }
   0xd   : > { %p640_p9 = scmp.eq.s32.totalorder %s872_s22, 0  ;;  %s172_s8 = sshll.u32 %s968_s1, 4  ;;  %s173_s8 = int_to_ptr.hbm [resolvable:$true] %s172_s8 }
   0xe   : > { %p900_p10 = pnand %p526_p7, %p161_p8  ;;  %s817_s9 = smov [#allocation2]  }
   0xf   : > { %s174_s10 = sshll.u32 %s817_s9, 4  ;;  %s189_s13 = sshll.u32 %s970_s3, 4  ;;  %s175_s10 = int_to_ptr.vmem [resolvable:$true] %s174_s10  ;;  %s190_s13 = int_to_ptr.hbm [resolvable:$true] %s189_s13 }
  0x10   : > { %p629_p11 = pneg %p900_p10  ;;  %s818_s14 = smov 64  }
  0x11   : > { %s819_s15 = smov 4   ;;  %s820_s16 = smov [#allocation5]  }
  0x12   : > { %p630_p12 = pnand %p640_p9, %p629_p11  ;;  %s191_s17 = sshll.u32 %s820_s16, 4  ;;  %s192_s17 = int_to_ptr.vmem [resolvable:$true] %s191_s17 }
  0x13   : > { %217 = sbr.rel (%p900_p10) target bundleno = 346 (0x15a), region = 40 }
  0x14   : > { %632 = dma.hbm_to_vmem [thread:$0]  (!%p630_p12), %s173_s8, 1024, %s175_s10, [#allocation3], %s818_s14, %s818_s14, %s819_s15  }
  0x15   : > { %635 = dma.hbm_to_vmem [thread:$0]  (!%p630_p12), %s190_s13, 1024, %s192_s17, [#allocation6], %s818_s14, %s818_s14, %s819_s15  }
  0x18   : > { %790 = dma.done.wait (%p640_p9), [#allocation3], 1024  }
  0x19   : > { %792 = vsyncadd (%p640_p9), [#allocation3], 4294966272 }
  0x1a   : > { %794 = dma.done.wait (%p640_p9), [#allocation6], 1024  }
  0x1b   : > { %796 = vsyncadd (%p640_p9), [#allocation6], 4294966272  ;;  %v610_v0 = vld [vmem:[#allocation2 + $0x38] sm:$0xff]  ;;  %v609_v1 = vld [vmem:[#allocation2 + $0x30] sm:$0xff]  ;;  %p250_p13 = scmp.lt.s32.totalorder %s872_s22, 1  ;;  %s247_s9 = sand.u32 1, %s807_s19  }
  0x1c   : > { %323 = vmatpush.bf16.msra.mxu0 %v610_v0  ;;  %v618_v2 = vld [vmem:[#allocation5 + $0x38] sm:$0xff]  ;;  %v608_v3 = vld [vmem:[#allocation2 + $0x28] sm:$0xff]  ;;  %v607_v4 = vld [vmem:[#allocation2 + $0x20] sm:$0xff]  ;;  %s600_s10 = sshll.u32 %s872_s22, 3  ;;  %s533_s11 = sshll.u32 %s247_s9, 3 }
  0x1d   : > { %414 = vmatpush.bf16.msra.mxu1 %v618_v2  ;;  %v606_v5 = vld [vmem:[#allocation2 + $0x18] sm:$0xff]  ;;  %v605_v6 = vld [vmem:[#allocation2 + $0x10] sm:$0xff]  ;;  %s251_s23 = scalar_select %p250_p13, %s872_s22, 1  ;;  %v604_v7 = vld [vmem:[#allocation2 + $0x8] sm:$0xff] }
  0x1e   : > { %v603_v8 = vld [vmem:[#allocation2] sm:$0xff]  ;;  %v617_v10 = vld [vmem:[#allocation5 + $0x30] sm:$0xff]  ;;  %v616_v11 = vld [vmem:[#allocation5 + $0x28] sm:$0xff]  ;;  %s439_s14 = scalar_lea.hbm %s972_s5, %s600_s10  ;;  %s249_s17 = scalar_lea.vmem [#allocation7], %s533_s11 }
  0x1f   : > { %s534_s25 = sshll.u32 %s251_s23, 2  ;;  %v615_v12 = vld [vmem:[#allocation5 + $0x20] sm:$0xff]  ;;  %v614_v13 = vld [vmem:[#allocation5 + $0x18] sm:$0xff]  ;;  %v613_v14 = vld [vmem:[#allocation5 + $0x10] sm:$0xff]  ;;  %s441_s23 = sshll.u32 %s249_s17, 4  ;;  %s442_s23 = int_to_ptr.vmem [resolvable:$true] %s441_s23 }
  0x20   : > { %324 = vmatpush.bf16.msra.mxu0 %v609_v1  ;;  %s253_s6 = scalar_lea.vmem %s967_s0, %s534_s25  ;;  %v612_v15 = vld [vmem:[#allocation5 + $0x8] sm:$0xff]  ;;  %v611_v16 = vld [vmem:[#allocation5] sm:$0xff]  ;;  %s443_s25 = sshll.u32 %s439_s14, 4  ;;  %s444_s25 = int_to_ptr.hbm [resolvable:$true] %s443_s25 }
  0x21   : > { %v254_v9 = vld [vmem:[%s253_s6] sm:$0xf]  ;;  %415 = vmatpush.bf16.msra.mxu1 %v617_v10  ;;  %s429_s26 = scalar_lea.sflag [#allocation4], %s247_s9  ;;  %s759_s22 = sshra.s32 %s444_s25, 4  ;;  %s760_s22 = int_to_ptr.hbm [resolvable:$true] %s759_s22 }
  0x22   : > { %v681_v17 = vld [vmem:[%s969_s2] ss:$0 sm:$0xff]  ;;  %s761_s30 = scalar_lea.hbm %s760_s22, 8  ;;  %s765_s8 = scalar_lea.hbm %s972_s5, 16 }
  0x23   : > { %v682_v31 = vld [vmem:[%s971_s4] ss:$0 sm:$0xff]  ;;  %p762_p0 = scmp.ne.s32.totalorder %s760_s22, %s761_s30  ;;  %p766_p3 = scmp.lt.s32.totalorder %s760_s22, %s972_s5 }
  0x24   : > { %325 = vmatpush.bf16.msra.mxu0 %v608_v3  ;;  %p767_p4 = scmp.lt.s32.totalorder %s765_s8, %s761_s30 }
  0x25   : > { %416 = vmatpush.bf16.msra.mxu1 %v616_v11  ;;  %p763_p1 = pnand %p762_p0, %p889_p5 }
  0x26   : > { %p768_p7 = por %p767_p4, %p766_p3 }
  0x27   : > { %p764_p2 = pneg %p763_p1 }
  0x28   : > { %326 = vmatpush.bf16.msra.mxu0 %v607_v4 }
  0x29   : > { %417 = vmatpush.bf16.msra.mxu1 %v615_v12  ;;  %p769_p8 = pnand %p768_p7, %p764_p2 }
  0x2c   : > { %327 = vmatpush.bf16.msra.mxu0 %v606_v5 }
  0x2d   : > { %418 = vmatpush.bf16.msra.mxu1 %v614_v13 }
  0x30   : > { %328 = vmatpush.bf16.msra.mxu0 %v605_v6 }
  0x31   : > { %419 = vmatpush.bf16.msra.mxu1 %v613_v14 }
  0x34   : > { %329 = vmatpush.bf16.msra.mxu0 %v604_v7 }
  0x35   : > { %420 = vmatpush.bf16.msra.mxu1 %v612_v15 }
  0x38   : > { %330 = vmatpush.bf16.msra.mxu0 %v603_v8 }
  0x39   : > { %421 = vmatpush.bf16.msra.mxu1 %v611_v16 }
  0x3b   : > { %331 = vmatmul.bf16.vlgmr.msra.gmra.mxu0 %v254_v9 }
  0xb8   : > { %v332_v18 = vpop.f32.mrf.mxu0 }
  0xb9   : > { %v333_v19 = vadd.f32 %v681_v17, %v332_v18 }
  0xbb   : > { %v336_v20 = vmul.f32 %v333_v19, %v333_v19 }
  0xbd   : > { %v337_v21 = vmul.f32 %v336_v20, %v333_v19 }
  0xbf   : > { %v338_v22 = vmul.f32 0.044715, %v337_v21 }
  0xc0   : > { %v334_v23 = vpop.f32.mrf.mxu0 }
  0xc1   : > { %v339_v24 = vadd.f32 %v338_v22, %v333_v19 }
  0xc3   : > { %v340_v25 = vmul.f32 0.7978846, %v339_v24 }
  0xc5   : > { %683 = vtanh.f32 %v340_v25 }
  0xcb   : > { %v684_v26 = vpop.eup %683 }
  0xcc   : > { %v342_v27 = vadd.f32 1.0, %v684_v26 }
  0xce   : > { %v343_v28 = vmul.f32 0.5, %v342_v27 }
  0xd0   : > { %v344_v29 = vmul.f32 %v343_v28, %v333_v19 }
  0xd2   : > { %v345_v30 = vpack.c.bf16 %v344_v29, %v344_v29 }
  0xd4   : > { %422 = vmatmul.bf16.vlgmr.msra.gmra.mxu1 %v345_v30 }
 0x151   : > { %v423_v32 = vpop.f32.mrf.mxu1 }
 0x152   : > { %v424_v33 = vadd.f32 %v682_v31, %v423_v32 }
 0x154   : > { %427 = vst [vmem:[%s249_s17] sm:$0xff] %v424_v33 }
 0x155   : > { %772 = shalt.err (!%p769_p8)
}
 0x156   : > { %627 = dma.vmem_to_hbm [thread:$0]  (%p889_p5), %s442_s23, 128, %s444_s25, %s429_s26  }
 0x159   : > { %v425_v34 = vpop.f32.mrf.mxu1 }
 0x15a PF: > { %p644_p9 = scmp.ge.s32.totalorder %s815_s21, 2  ;;  %s455_s9 = sand.u32 1, %s803_s18  }
 0x15b   : > { %s456_s12 = scalar_lea.sflag [#allocation4], %s455_s9 }
 0x15c   : > { %p637_p10 = pnand %p644_p9, %p893_p6 }
 0x15e   : > { %p638_p11 = pneg %p637_p10 }
 0x160   : > { %798 = dma.done.wait (%p638_p11), %s456_s12, 128  }
 0x161   : > { %800 = vsyncadd (%p638_p11), %s456_s12, 4294967168  ;;  %p17_p12 = scmp.ge.s32.totalorder %s876_s24, 4   ;;  %s976_s18 = smov %s807_s19 }
 0x162   : > { %s977_s19 = smov %s811_s20  ;;  %s978_s20 = smov %s887_s27 }
 0x163   : > { %s979_s21 = smov %s876_s24  ;;  %19 = sbr.rel (!%p17_p12) target bundleno = 5 (0x5), region = 84 }
 0x168   :  { %462 = vsyncpa [#allocation3], 1 }
 0x169   :  { %464 = vsyncpa [#allocation3 + $0x1], 1 }
 0x16a   :  { %465 = vsyncpa [#allocation6], 1 }
 0x16b   :  { %466 = vsyncpa [#allocation4], 1 }
 0x16c   :  { %468 = vsyncpa [#allocation4 + $0x1], 1 }

// kernel: _mlp_forward_impl.1
= control target key start
LH: loop header
LB: loop body
LE: loop exit
PB: predicated region body
PF: predicated region fallthrough
CT: control target
= control target key end

     0   :  { %10 = vsyncpa [#allocation3], 0  ;;  %s967_s0 = inlined_call_operand.vmem [shape: bf16[16,128], index: 0, kind: input, shape index: {}]   ;;  %s968_s1 = inlined_call_operand.hbm [shape: bf16[128,128], index: 1, kind: input, shape index: {}]   ;;  %s969_s2 = inlined_call_operand.vmem [shape: f32[1,128], index: 2, kind: input, shape index: {}]   ;;  %s970_s3 = inlined_call_operand.hbm [shape: bf16[128,128], index: 3, kind: input, shape index: {}]   ;;  %s971_s4 = inlined_call_operand.vmem [shape: f32[1,128], index: 4, kind: input, shape index: {}]   ;;  %s972_s5 = inlined_call_operand.hbm [shape: f32[16,128], index: 5, kind: output, shape index: {}]  }
   0x1   :  { %11 = vsyncpa [#allocation6], 0 }
   0x2   :  { %12 = vsyncpa [#allocation4], 0 }
   0x3   :  { %14 = vsyncpa [#allocation4 + $0x1], 0  ;;  %s851_s18 = smov 0   ;;  %s853_s19 = smov 0  }
   0x4   :  { %s855_s20 = smov 0   ;;  %s857_s21 = smov 0  }
   0x5 LB: > { %s872_s22 = sadd.s32 4294967295, %s815_s21   ;;  %s525_s23 = sadd.s32 4294967294, %s815_s21   ;;  %s815_s21 = sphi %s857_s21, %s979_s21   ;;  %s811_s20 = sphi %s855_s20, %s978_s20   ;;  %s807_s19 = sphi %s853_s19, %s977_s19   ;;  %s803_s18 = sphi %s851_s18, %s976_s18  }
   0x6   : > { %s876_s24 = sadd.s32 1, %s815_s21   ;;  %s137_s25 = sadd.s32 1, %s811_s20 }
   0x7   : > { %s134_s26 = ssub.s32 %s815_s21, %s876_s24  ;;  %p147_p0 = scmp.ne.s32.totalorder %s811_s20, %s807_s19 }
   0x8   : > { %p135_p1 = scmp.eq.s32.totalorder %s134_s26, 0  ;;  %p148_p2 = scmp.eq.s32.totalorder %s872_s22, 1 }
   0x9   : > { %p153_p3 = scmp.ne.s32.totalorder %s807_s19, %s803_s18  ;;  %p154_p4 = scmp.eq.s32.totalorder %s525_s23, 1 }
   0xa   : > { %s887_s27 = scalar_select %p135_p1, %s811_s20, %s137_s25  }
   0xb   : > { %p889_p5 = por %p148_p2, %p147_p0  ;;  %p893_p6 = por %p154_p4, %p153_p3 }
   0xc   : > { %p526_p7 = scmp.ge.s32.totalorder %s815_s21, 1  ;;  %p161_p8 = scmp.lt.s32.totalorder %s815_s21, 3 }
   0xd   : > { %p640_p9 = scmp.eq.s32.totalorder %s872_s22, 0  ;;  %s172_s8 = sshll.u32 %s968_s1, 4  ;;  %s173_s8 = int_to_ptr.hbm [resolvable:$true] %s172_s8 }
   0xe   : > { %p900_p10 = pnand %p526_p7, %p161_p8  ;;  %s817_s9 = smov [#allocation2]  }
   0xf   : > { %s174_s10 = sshll.u32 %s817_s9, 4  ;;  %s189_s13 = sshll.u32 %s970_s3, 4  ;;  %s175_s10 = int_to_ptr.vmem [resolvable:$true] %s174_s10  ;;  %s190_s13 = int_to_ptr.hbm [resolvable:$true] %s189_s13 }
  0x10   : > { %p629_p11 = pneg %p900_p10  ;;  %s818_s14 = smov 64  }
  0x11   : > { %s819_s15 = smov 4   ;;  %s820_s16 = smov [#allocation5]  }
  0x12   : > { %p630_p12 = pnand %p640_p9, %p629_p11  ;;  %s191_s17 = sshll.u32 %s820_s16, 4  ;;  %s192_s17 = int_to_ptr.vmem [resolvable:$true] %s191_s17 }
  0x13   : > { %217 = sbr.rel (%p900_p10) target bundleno = 346 (0x15a), region = 40 }
  0x14   : > { %632 = dma.hbm_to_vmem [thread:$0]  (!%p630_p12), %s173_s8, 1024, %s175_s10, [#allocation3], %s818_s14, %s818_s14, %s819_s15  }
  0x15   : > { %635 = dma.hbm_to_vmem [thread:$0]  (!%p630_p12), %s190_s13, 1024, %s192_s17, [#allocation6], %s818_s14, %s818_s14, %s819_s15  }
  0x18   : > { %790 = dma.done.wait (%p640_p9), [#allocation3], 1024  }
  0x19   : > { %792 = vsyncadd (%p640_p9), [#allocation3], 4294966272 }
  0x1a   : > { %794 = dma.done.wait (%p640_p9), [#allocation6], 1024  }
  0x1b   : > { %796 = vsyncadd (%p640_p9), [#allocation6], 4294966272  ;;  %v610_v0 = vld [vmem:[#allocation2 + $0x38] sm:$0xff]  ;;  %v609_v1 = vld [vmem:[#allocation2 + $0x30] sm:$0xff]  ;;  %p250_p13 = scmp.lt.s32.totalorder %s872_s22, 1  ;;  %s247_s9 = sand.u32 1, %s807_s19  }
  0x1c   : > { %323 = vmatpush.bf16.msra.mxu0 %v610_v0  ;;  %v618_v2 = vld [vmem:[#allocation5 + $0x38] sm:$0xff]  ;;  %v608_v3 = vld [vmem:[#allocation2 + $0x28] sm:$0xff]  ;;  %v607_v4 = vld [vmem:[#allocation2 + $0x20] sm:$0xff]  ;;  %s600_s10 = sshll.u32 %s872_s22, 3  ;;  %s533_s11 = sshll.u32 %s247_s9, 3 }
  0x1d   : > { %414 = vmatpush.bf16.msra.mxu1 %v618_v2  ;;  %v606_v5 = vld [vmem:[#allocation2 + $0x18] sm:$0xff]  ;;  %v605_v6 = vld [vmem:[#allocation2 + $0x10] sm:$0xff]  ;;  %s251_s23 = scalar_select %p250_p13, %s872_s22, 1  ;;  %v604_v7 = vld [vmem:[#allocation2 + $0x8] sm:$0xff] }
  0x1e   : > { %v603_v8 = vld [vmem:[#allocation2] sm:$0xff]  ;;  %v617_v10 = vld [vmem:[#allocation5 + $0x30] sm:$0xff]  ;;  %v616_v11 = vld [vmem:[#allocation5 + $0x28] sm:$0xff]  ;;  %s439_s14 = scalar_lea.hbm %s972_s5, %s600_s10  ;;  %s249_s17 = scalar_lea.vmem [#allocation7], %s533_s11 }
  0x1f   : > { %s534_s25 = sshll.u32 %s251_s23, 2  ;;  %v615_v12 = vld [vmem:[#allocation5 + $0x20] sm:$0xff]  ;;  %v614_v13 = vld [vmem:[#allocation5 + $0x18] sm:$0xff]  ;;  %v613_v14 = vld [vmem:[#allocation5 + $0x10] sm:$0xff]  ;;  %s441_s23 = sshll.u32 %s249_s17, 4  ;;  %s442_s23 = int_to_ptr.vmem [resolvable:$true] %s441_s23 }
  0x20   : > { %324 = vmatpush.bf16.msra.mxu0 %v609_v1  ;;  %s253_s6 = scalar_lea.vmem %s967_s0, %s534_s25  ;;  %v612_v15 = vld [vmem:[#allocation5 + $0x8] sm:$0xff]  ;;  %v611_v16 = vld [vmem:[#allocation5] sm:$0xff]  ;;  %s443_s25 = sshll.u32 %s439_s14, 4  ;;  %s444_s25 = int_to_ptr.hbm [resolvable:$true] %s443_s25 }
  0x21   : > { %v254_v9 = vld [vmem:[%s253_s6] sm:$0xf]  ;;  %415 = vmatpush.bf16.msra.mxu1 %v617_v10  ;;  %s429_s26 = scalar_lea.sflag [#allocation4], %s247_s9  ;;  %s759_s22 = sshra.s32 %s444_s25, 4  ;;  %s760_s22 = int_to_ptr.hbm [resolvable:$true] %s759_s22 }
  0x22   : > { %v681_v17 = vld [vmem:[%s969_s2] ss:$0 sm:$0xff]  ;;  %s761_s30 = scalar_lea.hbm %s760_s22, 8  ;;  %s765_s8 = scalar_lea.hbm %s972_s5, 16 }
  0x23   : > { %v682_v31 = vld [vmem:[%s971_s4] ss:$0 sm:$0xff]  ;;  %p762_p0 = scmp.ne.s32.totalorder %s760_s22, %s761_s30  ;;  %p766_p3 = scmp.lt.s32.totalorder %s760_s22, %s972_s5 }
  0x24   : > { %325 = vmatpush.bf16.msra.mxu0 %v608_v3  ;;  %p767_p4 = scmp.lt.s32.totalorder %s765_s8, %s761_s30 }
  0x25   : > { %416 = vmatpush.bf16.msra.mxu1 %v616_v11  ;;  %p763_p1 = pnand %p762_p0, %p889_p5 }
  0x26   : > { %p768_p7 = por %p767_p4, %p766_p3 }
  0x27   : > { %p764_p2 = pneg %p763_p1 }
  0x28   : > { %326 = vmatpush.bf16.msra.mxu0 %v607_v4 }
  0x29   : > { %417 = vmatpush.bf16.msra.mxu1 %v615_v12  ;;  %p769_p8 = pnand %p768_p7, %p764_p2 }
  0x2c   : > { %327 = vmatpush.bf16.msra.mxu0 %v606_v5 }
  0x2d   : > { %418 = vmatpush.bf16.msra.mxu1 %v614_v13 }
  0x30   : > { %328 = vmatpush.bf16.msra.mxu0 %v605_v6 }
  0x31   : > { %419 = vmatpush.bf16.msra.mxu1 %v613_v14 }
  0x34   : > { %329 = vmatpush.bf16.msra.mxu0 %v604_v7 }
  0x35   : > { %420 = vmatpush.bf16.msra.mxu1 %v612_v15 }
  0x38   : > { %330 = vmatpush.bf16.msra.mxu0 %v603_v8 }
  0x39   : > { %421 = vmatpush.bf16.msra.mxu1 %v611_v16 }
  0x3b   : > { %331 = vmatmul.bf16.vlgmr.msra.gmra.mxu0 %v254_v9 }
  0xb8   : > { %v332_v18 = vpop.f32.mrf.mxu0 }
  0xb9   : > { %v333_v19 = vadd.f32 %v681_v17, %v332_v18 }
  0xbb   : > { %v336_v20 = vmul.f32 %v333_v19, %v333_v19 }
  0xbd   : > { %v337_v21 = vmul.f32 %v336_v20, %v333_v19 }
  0xbf   : > { %v338_v22 = vmul.f32 0.044715, %v337_v21 }
  0xc0   : > { %v334_v23 = vpop.f32.mrf.mxu0 }
  0xc1   : > { %v339_v24 = vadd.f32 %v338_v22, %v333_v19 }
  0xc3   : > { %v340_v25 = vmul.f32 0.7978846, %v339_v24 }
  0xc5   : > { %683 = vtanh.f32 %v340_v25 }
  0xcb   : > { %v684_v26 = vpop.eup %683 }
  0xcc   : > { %v342_v27 = vadd.f32 1.0, %v684_v26 }
  0xce   : > { %v343_v28 = vmul.f32 0.5, %v342_v27 }
  0xd0   : > { %v344_v29 = vmul.f32 %v343_v28, %v333_v19 }
  0xd2   : > { %v345_v30 = vpack.c.bf16 %v344_v29, %v344_v29 }
  0xd4   : > { %422 = vmatmul.bf16.vlgmr.msra.gmra.mxu1 %v345_v30 }
 0x151   : > { %v423_v32 = vpop.f32.mrf.mxu1 }
 0x152   : > { %v424_v33 = vadd.f32 %v682_v31, %v423_v32 }
 0x154   : > { %427 = vst [vmem:[%s249_s17] sm:$0xff] %v424_v33 }
 0x155   : > { %772 = shalt.err (!%p769_p8)
}
 0x156   : > { %627 = dma.vmem_to_hbm [thread:$0]  (%p889_p5), %s442_s23, 128, %s444_s25, %s429_s26  }
 0x159   : > { %v425_v34 = vpop.f32.mrf.mxu1 }
 0x15a PF: > { %p644_p9 = scmp.ge.s32.totalorder %s815_s21, 2  ;;  %s455_s9 = sand.u32 1, %s803_s18  }
 0x15b   : > { %s456_s12 = scalar_lea.sflag [#allocation4], %s455_s9 }
 0x15c   : > { %p637_p10 = pnand %p644_p9, %p893_p6 }
 0x15e   : > { %p638_p11 = pneg %p637_p10 }
 0x160   : > { %798 = dma.done.wait (%p638_p11), %s456_s12, 128  }
 0x161   : > { %800 = vsyncadd (%p638_p11), %s456_s12, 4294967168  ;;  %p17_p12 = scmp.ge.s32.totalorder %s876_s24, 4   ;;  %s976_s18 = smov %s807_s19 }
 0x162   : > { %s977_s19 = smov %s811_s20  ;;  %s978_s20 = smov %s887_s27 }
 0x163   : > { %s979_s21 = smov %s876_s24  ;;  %19 = sbr.rel (!%p17_p12) target bundleno = 5 (0x5), region = 84 }
 0x168   :  { %462 = vsyncpa [#allocation3], 1 }
 0x169   :  { %464 = vsyncpa [#allocation3 + $0x1], 1 }
 0x16a   :  { %465 = vsyncpa [#allocation6], 1 }
 0x16b   :  { %466 = vsyncpa [#allocation4], 1 }
 0x16c   :  { %468 = vsyncpa [#allocation4 + $0x1], 1 }

</bundles_post_ra>
